<compile_context>
chip_gen: v6e
topology: v6e:2x2x1
jax: 0.10.0
libtpu: 0.0.40
codegen_flags: <defaults>
</compile_context>

<pallas_src>
import math
import functools

import jax
import jax.numpy as jnp
from jax.experimental import pallas as pl
from jax.experimental.pallas import tpu as pltpu


def _multihead_kernel(
    x_ref,       # (1, TQ, C)            bf16  query-token tile
    kt_ref,      # (1, Cr, heads*P)      bf16  per-head K^T, lane-stacked (scale folded into q)
    vf_ref,      # (1, heads*P, C)       bf16  per-head V rows (gamma_h/heads folded)
    valid_ref,   # (1, 1, P)             f32   1.0 where point index is valid (>0)
    wq_ref,      # (C, heads*Cr)         bf16  fused query weight, pre-transposed, scale folded
    bq_ref,      # (1, heads*Cr)         f32   fused query bias, scale folded
    wcf_ref,     # (C, C)                bf16  1x1 conv weight (Cin, Cout), BN scale folded
    bnt_ref,     # (1, C)                f32   folded BN shift
    out_ref,     # (1, TQ, C)            bf16
    *,
    heads,
    cr,
    p,
):
    x = x_ref[0]                                             # (TQ, C)        bf16
    kt = kt_ref[0]                                           # (Cr, heads*P)  bf16
    valid = valid_ref[0]                                     # (1, P)         f32

    # Fused query projection for all heads: one wide MXU matmul (scale folded).
    q = jnp.dot(x, wq_ref[...], preferred_element_type=jnp.float32) + bq_ref[...]
    q_bf = q.astype(jnp.bfloat16)                            # (TQ, heads*Cr)

    # Per-head masked softmax; normalized segments are gathered into a single
    # (TQ, heads*P) slab so ONE matmul does attn@V and the head-sum at once.
    attn_segs = []
    for h in range(heads):                                   # heads is small & static -> unrolled
        qh = q_bf[:, h * cr:(h + 1) * cr]                    # (TQ, Cr) bf16
        kh = kt[:, h * p:(h + 1) * p]                        # (Cr, P)  bf16
        energy = jnp.dot(qh, kh, preferred_element_type=jnp.float32)    # (TQ, P) f32

        # Masked softmax over the point axis.  Batches with zero valid points
        # produce an all-zero attention row (matches the reference code path).
        e_m = jnp.where(valid > 0.0, energy, jnp.float32(-1e30))
        m = jnp.max(e_m, axis=-1, keepdims=True)
        ex = jnp.exp(e_m - m) * valid
        denom = jnp.sum(ex, axis=-1, keepdims=True)
        inv = pl.reciprocal(jnp.where(denom == 0.0, jnp.float32(1.0), denom),
                            approx=True)
        attn_segs.append((ex * inv).astype(jnp.bfloat16))

    attn = jnp.concatenate(attn_segs, axis=-1)               # (TQ, heads*P) bf16
    acc = jnp.dot(attn, vf_ref[0], preferred_element_type=jnp.float32)   # (TQ, C) f32

    # Residual (hoisted out of the head loop): feats = x + sum_h gamma_h/heads * out_h
    feats = x.astype(jnp.float32) + acc

    # conv1: 1x1 conv (no bias, BN scale folded into weight) + BN shift + ReLU.
    # TODO(synk): training-mode BatchNorm (batch statistics over B*H*W) is not
    # implemented; eval-mode BN with running stats is folded into the conv.
    z = jnp.dot(feats.astype(jnp.bfloat16), wcf_ref[...],
                preferred_element_type=jnp.float32)           # (TQ, C)
    out_ref[0] = jnp.maximum(z + bnt_ref[...], 0.0).astype(out_ref.dtype)


def multihead_forward(x_nchw, points, params, *, heads=4, reduction=3, ratio=4, tq=None):
    B, C, H, W = x_nchw.shape
    HW = H * W
    P = points.shape[1]
    Cr = C // reduction
    bf = jnp.bfloat16

    # Query-tile size: largest "nice" divisor of HW (multiple of 8), else whole HW.
    # 1024 is worthwhile on v5e/v6e (128 MiB VMEM); cap at 512 on v7x (64 MiB)
    # for production C.
    if tq is None:
        tq = HW
        for cand in (1024, 512, 256, 128, 64, 32, 16, 8):
            if HW % cand == 0:
                tq = cand
                break
    assert HW % tq == 0 and (tq % 8 == 0 or tq == HW)
    n_tiles = HW // tq

    # NCHW->NHWC transpose + bf16 cast in ONE fused XLA pass (no f32 staging copy).
    x_bf = jnp.transpose(x_nchw, (0, 2, 3, 1)).reshape(B, HW, C).astype(bf)

    # ---- point preprocessing (glue: integer index math, mirrors reference) ----
    pts = points.astype(jnp.int32)
    bad = (pts[:, :, 0] >= H * ratio) | (pts[:, :, 1] >= W * ratio)
    pts = jnp.where(bad[:, :, None], -1, pts)
    sel = (pts[:, :, 0] // ratio) * W + (pts[:, :, 1] // ratio)   # floor division (torch //)
    valid = sel > 0                                               # strictly positive, as in reduce_point
    valid_f = valid.astype(jnp.float32)[:, None, :]               # (B, 1, P)

    # Direct row gather of the selected tokens (tiny B*P*C copy).
    sel_c = jnp.clip(sel, 0, HW - 1)
    x_sel = jnp.take_along_axis(x_bf, sel_c[:, :, None], axis=1)              # (B, P, C) bf16
    x_sel = jnp.where(valid[:, :, None], x_sel, jnp.zeros((), bf))            # zero invalid rows
    x_sel_f = x_sel.astype(jnp.float32)

    # ---- fold constants & pre-transpose weight slabs to (K, N) MXU layout ----
    scale = float(math.sqrt(reduction / C))                                   # np.sqrt(reduction / C)
    wq_t = (params["wq"].reshape(heads * Cr, C) * scale).T.astype(bf)         # (C, heads*Cr)
    bq = (params["bq"].reshape(1, heads * Cr) * scale).astype(jnp.float32)
    wk_all = params["wk"].reshape(heads * Cr, C)
    bk_all = params["bk"].reshape(1, heads * Cr)
    g = (params["gamma"] / heads).astype(jnp.float32)                         # (heads,)
    wv_all = (params["wv"] * g[:, None, None]).reshape(heads * C, C)          # gamma/heads folded
    bv_all = (params["bv"] * g[:, None, None]).reshape(1, heads * C)
    wcf_t = (params["wc"] * params["bn_s"].reshape(C, 1)).T.astype(bf)        # (Cin, Cout), BN scale folded
    bnt = params["bn_t"].astype(jnp.float32)                                  # (1, C)

    # ---- precompute K / V of the P selected points (tiny B*P*C matmuls) ----
    k_sel = jnp.einsum("bpc,kc->bpk", x_sel_f, wk_all) + bk_all               # (B, P, heads*Cr)
    v_sel = jnp.einsum("bpc,kc->bpk", x_sel_f, wv_all) + bv_all               # (B, P, heads*C)
    # K^T slabs lane-stacked per head: k_t[b, r, h*P + p] = K_h[b, p, r]
    k_t = (k_sel.reshape(B, P, heads, Cr).transpose(0, 3, 2, 1)
           .reshape(B, Cr, heads * P).astype(bf))
    # V rows stacked per head: v_f[b, h*P + p, :] = (gamma_h/heads) * V_h[b, p, :]
    v_f = (v_sel.reshape(B, P, heads, C).transpose(0, 2, 1, 3)
           .reshape(B, heads * P, C).astype(bf))

    kernel = functools.partial(_multihead_kernel, heads=heads, cr=Cr, p=P)

    # NOTE: at production C, the grid-invariant operands below could use
    # pipeline_mode=pl.Buffered(1) to avoid double-buffering them in VMEM.
    grid_spec = pltpu.PrefetchScalarGridSpec(
        num_scalar_prefetch=0,
        grid=(B, n_tiles),
        in_specs=[
            pl.BlockSpec((1, tq, C), lambda b, t: (b, t, 0)),                 # x tile
            pl.BlockSpec((1, Cr, heads * P), lambda b, t: (b, 0, 0)),         # K^T slab (per batch)
            pl.BlockSpec((1, heads * P, C), lambda b, t: (b, 0, 0)),          # V slab  (per batch)
            pl.BlockSpec((1, 1, P), lambda b, t: (b, 0, 0)),                  # valid mask
            pl.BlockSpec((C, heads * Cr), lambda b, t: (0, 0)),               # wq (fused heads, scale folded)
            pl.BlockSpec((1, heads * Cr), lambda b, t: (0, 0)),               # bq
            pl.BlockSpec((C, C), lambda b, t: (0, 0)),                        # conv weight (BN scale folded)
            pl.BlockSpec((1, C), lambda b, t: (0, 0)),                        # BN shift
        ],
        out_specs=pl.BlockSpec((1, tq, C), lambda b, t: (b, t, 0)),
    )

    out_flat = pl.pallas_call(
        kernel,
        out_shape=jax.ShapeDtypeStruct((B, HW, C), bf),                       # bf16 output: half the store traffic
        grid_spec=grid_spec,
        compiler_params=pltpu.CompilerParams(
            dimension_semantics=("parallel", "parallel")),                    # no cross-tile carry -> both parallel
    )(x_bf, k_t, v_f, valid_f, wq_t, bq, wcf_t, bnt)

    # NHWC -> NCHW on the bf16 result; the f32 cast fuses with the transpose.
    # (Return bf16 / NHWC directly if the consumer allows, to save this pass.)
    out = jnp.transpose(out_flat.reshape(B, H, W, C), (0, 3, 1, 2))
    return out.astype(jnp.float32)


def init_params(key, C, heads, reduction):
    """Deterministic synthetic parameters with the shapes implied by __init__."""
    Cr = C // reduction
    ks = jax.random.split(key, 11)

    def w(k, shape, fan_in):
        return jax.random.normal(k, shape, jnp.float32) / jnp.sqrt(float(fan_in))

    params = dict(
        wq=w(ks[0], (heads, Cr, C), C),
        bq=0.01 * jax.random.normal(ks[1], (heads, 1, Cr), jnp.float32),
        wk=w(ks[2], (heads, Cr, C), C),
        bk=0.01 * jax.random.normal(ks[3], (heads, 1, Cr), jnp.float32),
        wv=w(ks[4], (heads, C, C), C),
        bv=0.01 * jax.random.normal(ks[5], (heads, 1, C), jnp.float32),
        # NOTE: reference initializes gamma to zero (attention branch would be
        # a no-op); use deterministic nonzero values so the hot path matters.
        gamma=0.1 * (jnp.arange(heads, dtype=jnp.float32) + 1.0),
        wc=w(ks[6], (C, C), C),
    )
    # BatchNorm2d (eval mode): fold weight / bias / running stats into scale+shift.
    bn_w = 1.0 + 0.1 * jax.random.normal(ks[7], (C,), jnp.float32)
    bn_b = 0.1 * jax.random.normal(ks[8], (C,), jnp.float32)
    bn_mean = 0.1 * jax.random.normal(ks[9], (C,), jnp.float32)
    bn_var = 1.0 + 0.1 * jnp.abs(jax.random.normal(ks[10], (C,), jnp.float32))
    s = bn_w / jnp.sqrt(bn_var + 1e-5)
    params["bn_s"] = s.reshape(1, C)
    params["bn_t"] = (bn_b - bn_mean * s).reshape(1, C)
    return params


def reference_forward(x_nchw, points, params, *, heads, reduction, ratio):
    """Pure-JAX f32 reference (same math, no Pallas) used as a correctness check."""
    B, C, H, W = x_nchw.shape
    HW = H * W
    xf = jnp.transpose(x_nchw, (0, 2, 3, 1)).reshape(B, HW, C).astype(jnp.float32)
    pts = points.astype(jnp.int32)
    bad = (pts[:, :, 0] >= H * ratio) | (pts[:, :, 1] >= W * ratio)
    pts = jnp.where(bad[:, :, None], -1, pts)
    sel = (pts[:, :, 0] // ratio) * W + (pts[:, :, 1] // ratio)
    valid = sel > 0
    oh = ((sel[:, :, None] == jnp.arange(HW)[None, None, :]) & valid[:, :, None]).astype(jnp.float32)
    vm = valid.astype(jnp.float32)[:, None, :]
    scale = math.sqrt(reduction / C)
    feats = jnp.zeros_like(xf)
    for h in range(heads):
        q = jnp.einsum("bnc,rc->bnr", xf, params["wq"][h]) + params["bq"][h]
        k = jnp.einsum("bnc,rc->bnr", xf, params["wk"][h]) + params["bk"][h]
        v = jnp.einsum("bnc,oc->bno", xf, params["wv"][h]) + params["bv"][h]
        ksel = jnp.einsum("bpn,bnr->bpr", oh, k)
        vsel = jnp.einsum("bpn,bnc->bpc", oh, v)
        energy = jnp.einsum("bnr,bpr->bnp", q, ksel) * scale
        em = jnp.where(vm > 0, energy, -1e30)
        m = jnp.max(em, axis=-1, keepdims=True)
        ex = jnp.exp(em - m) * vm
        den = jnp.sum(ex, axis=-1, keepdims=True)
        attn = ex / jnp.where(den == 0.0, 1.0, den)
        out_attn = jnp.einsum("bnp,bpc->bnc", attn, vsel)
        feats = feats + (params["gamma"][h] * out_attn + xf) / heads
    z = jnp.einsum("bnc,oc->bno", feats, params["wc"])
    y = jnp.maximum(z * params["bn_s"] + params["bn_t"], 0.0)
    return jnp.transpose(y.reshape(B, H, W, C), (0, 3, 1, 2))


if __name__ == "__main__":
    B, C, H, W = 2, 12, 8, 8
    heads, reduction, ratio = 4, 3, 4
    P = 8

    key = jax.random.PRNGKey(0)
    k_x, k_p, k_w = jax.random.split(key, 3)

    x = jax.random.normal(k_x, (B, C, H, W), jnp.float32)
    points = jax.random.randint(k_p, (B, P, 2), 0, H * ratio + 6, dtype=jnp.int32)
    # exercise edge cases: negative point, point mapping to spatial index 0
    points = points.at[0, 0].set(jnp.array([-1, -1], jnp.int32))
    points = points.at[0, 1].set(jnp.array([0, 0], jnp.int32))

    params = init_params(k_w, C, heads, reduction)

    # tq=32 -> 2 HW tiles per batch element, exercising the tiled (parallel) grid.
    out = multihead_forward(x, points, params, heads=heads, reduction=reduction,
                            ratio=ratio, tq=32)
    out = jax.block_until_ready(out)

    ref = reference_forward(x, points, params, heads=heads, reduction=reduction, ratio=ratio)
    assert out.shape == (B, C, H, W)
    max_err = float(jnp.max(jnp.abs(out - ref)))
    # kernel runs matmuls in bf16 (f32 accumulation) and emits bf16; compare vs f32 reference
    assert jnp.allclose(out, ref, rtol=5e-2, atol=5e-2), max_err

    print("KERNEL_OK")
</pallas_src>

<mosaic_0001>
module attributes {stable_mosaic.version = 11 : i64} {
  func.func @_multihead_kernel(%arg0: i32, %arg1: i32, %arg2: memref<1x32x12xbf16, #tpu.memory_space<vmem>>, %arg3: memref<1x4x32xbf16, #tpu.memory_space<vmem>>, %arg4: memref<1x32x12xbf16, #tpu.memory_space<vmem>>, %arg5: memref<1x1x8xf32, #tpu.memory_space<vmem>>, %arg6: memref<12x16xbf16, #tpu.memory_space<vmem>>, %arg7: memref<1x16xf32, #tpu.memory_space<vmem>>, %arg8: memref<12x12xbf16, #tpu.memory_space<vmem>>, %arg9: memref<1x12xf32, #tpu.memory_space<vmem>>, %arg10: memref<1x32x12xbf16, #tpu.memory_space<vmem>>) attributes {dimension_semantics = [#tpu.dimension_semantics<parallel>, #tpu.dimension_semantics<parallel>], iteration_bounds = array<i64: 2, 2>, scalar_prefetch = 0 : i64, scratch_operands = 0 : i64, tpu.core_type = #tpu.core_type<tc>, window_params = [{transform_indices = @transform_0, window_bounds = array<i64: 1, 32, 12>}, {transform_indices = @transform_1, window_bounds = array<i64: 1, 4, 32>}, {transform_indices = @transform_2, window_bounds = array<i64: 1, 32, 12>}, {transform_indices = @transform_3, window_bounds = array<i64: 1, 1, 8>}, {pipeline_mode = #tpu.pipeline_mode<synchronous>, transform_indices = @transform_4, window_bounds = array<i64: 12, 16>}, {pipeline_mode = #tpu.pipeline_mode<synchronous>, transform_indices = @transform_5, window_bounds = array<i64: 1, 16>}, {pipeline_mode = #tpu.pipeline_mode<synchronous>, transform_indices = @transform_6, window_bounds = array<i64: 12, 12>}, {pipeline_mode = #tpu.pipeline_mode<synchronous>, transform_indices = @transform_7, window_bounds = array<i64: 1, 12>}, {transform_indices = @transform_8, window_bounds = array<i64: 1, 32, 12>}]} {
    %c0 = arith.constant 0 : index
    %c0_0 = arith.constant 0 : index
    %c0_1 = arith.constant 0 : index
    %0 = vector.load %arg2[%c0, %c0_0, %c0_1] : memref<1x32x12xbf16, #tpu.memory_space<vmem>>, vector<1x32x12xbf16>
    %1 = vector.shape_cast %0 : vector<1x32x12xbf16> to vector<32x12xbf16>
    %c0_2 = arith.constant 0 : index
    %c0_3 = arith.constant 0 : index
    %c0_4 = arith.constant 0 : index
    %2 = vector.load %arg3[%c0_2, %c0_3, %c0_4] : memref<1x4x32xbf16, #tpu.memory_space<vmem>>, vector<1x4x32xbf16>
    %3 = vector.shape_cast %2 : vector<1x4x32xbf16> to vector<4x32xbf16>
    %c0_5 = arith.constant 0 : index
    %c0_6 = arith.constant 0 : index
    %c0_7 = arith.constant 0 : index
    %4 = vector.load %arg5[%c0_5, %c0_6, %c0_7] : memref<1x1x8xf32, #tpu.memory_space<vmem>>, vector<1x1x8xf32>
    %5 = vector.shape_cast %4 : vector<1x1x8xf32> to vector<1x8xf32>
    %c0_8 = arith.constant 0 : index
    %c0_9 = arith.constant 0 : index
    %6 = vector.load %arg6[%c0_8, %c0_9] : memref<12x16xbf16, #tpu.memory_space<vmem>>, vector<12x16xbf16>
    %cst = arith.constant dense<0.000000e+00> : vector<32x16xf32>
    %7 = tpu.matmul %1, %6, %cst {dimension_numbers = #tpu.dot_dimension_numbers<[1], [0], [0], [1], [0, 0, 1, 1], [], []>} : vector<32x12xbf16>, vector<12x16xbf16>, vector<32x16xf32> -> vector<32x16xf32>
    %c0_10 = arith.constant 0 : index
    %c0_11 = arith.constant 0 : index
    %8 = vector.load %arg7[%c0_10, %c0_11] : memref<1x16xf32, #tpu.memory_space<vmem>>, vector<1x16xf32>
    %9 = vector.broadcast %8 : vector<1x16xf32> to vector<32x16xf32>
    %10 = arith.addf %7, %9 : vector<32x16xf32>
    %11 = arith.truncf %10 : vector<32x16xf32> to vector<32x16xbf16>
    %12 = vector.extract_strided_slice %11 {offsets = [0, 0], sizes = [32, 4], strides = [1, 1]} : vector<32x16xbf16> to vector<32x4xbf16>
    %13 = vector.extract_strided_slice %3 {offsets = [0, 0], sizes = [4, 8], strides = [1, 1]} : vector<4x32xbf16> to vector<4x8xbf16>
    %cst_12 = arith.constant dense<0.000000e+00> : vector<32x8xf32>
    %14 = tpu.matmul %12, %13, %cst_12 {dimension_numbers = #tpu.dot_dimension_numbers<[1], [0], [0], [1], [0, 0, 1, 1], [], []>} : vector<32x4xbf16>, vector<4x8xbf16>, vector<32x8xf32> -> vector<32x8xf32>
    %cst_13 = arith.constant 0.000000e+00 : f32
    %15 = vector.broadcast %cst_13 : f32 to vector<1x8xf32>
    %16 = arith.cmpf ogt, %5, %15 : vector<1x8xf32>
    %cst_14 = arith.constant -1.000000e+30 : f32
    %17 = vector.shape_cast %16 : vector<1x8xi1> to vector<1x8xi1>
    %18 = vector.broadcast %17 : vector<1x8xi1> to vector<32x8xi1>
    %19 = vector.broadcast %cst_14 : f32 to vector<32x8xf32>
    %20 = arith.select %18, %14, %19 : vector<32x8xi1>, vector<32x8xf32>
    %cst_15 = arith.constant dense<0xFF800000> : vector<32xf32>
    %21 = vector.multi_reduction <maximumf>, %20, %cst_15 [1] : vector<32x8xf32> to vector<32xf32>
    %22 = vector.shape_cast %21 : vector<32xf32> to vector<32x1xf32>
    %23 = vector.broadcast %22 : vector<32x1xf32> to vector<32x8xf32>
    %24 = arith.subf %20, %23 : vector<32x8xf32>
    %25 = math.exp %24 : vector<32x8xf32>
    %26 = vector.broadcast %5 : vector<1x8xf32> to vector<32x8xf32>
    %27 = arith.mulf %25, %26 : vector<32x8xf32>
    %cst_16 = arith.constant dense<0.000000e+00> : vector<32xf32>
    %28 = vector.multi_reduction <add>, %27, %cst_16 [1] : vector<32x8xf32> to vector<32xf32>
    %29 = vector.shape_cast %28 : vector<32xf32> to vector<32x1xf32>
    %cst_17 = arith.constant 0.000000e+00 : f32
    %30 = vector.broadcast %cst_17 : f32 to vector<32x1xf32>
    %31 = arith.cmpf oeq, %29, %30 : vector<32x1xf32>
    %cst_18 = arith.constant 1.000000e+00 : f32
    %32 = vector.broadcast %cst_18 : f32 to vector<32x1xf32>
    %33 = arith.select %31, %32, %29 : vector<32x1xi1>, vector<32x1xf32>
    %34 = tpu.reciprocal %33 {approx = true} : vector<32x1xf32> -> vector<32x1xf32>
    %35 = vector.broadcast %34 : vector<32x1xf32> to vector<32x8xf32>
    %36 = arith.mulf %27, %35 : vector<32x8xf32>
    %37 = arith.truncf %36 : vector<32x8xf32> to vector<32x8xbf16>
    %38 = vector.extract_strided_slice %11 {offsets = [0, 4], sizes = [32, 4], strides = [1, 1]} : vector<32x16xbf16> to vector<32x4xbf16>
    %39 = vector.extract_strided_slice %3 {offsets = [0, 8], sizes = [4, 8], strides = [1, 1]} : vector<4x32xbf16> to vector<4x8xbf16>
    %cst_19 = arith.constant dense<0.000000e+00> : vector<32x8xf32>
    %40 = tpu.matmul %38, %39, %cst_19 {dimension_numbers = #tpu.dot_dimension_numbers<[1], [0], [0], [1], [0, 0, 1, 1], [], []>} : vector<32x4xbf16>, vector<4x8xbf16>, vector<32x8xf32> -> vector<32x8xf32>
    %cst_20 = arith.constant 0.000000e+00 : f32
    %41 = vector.broadcast %cst_20 : f32 to vector<1x8xf32>
    %42 = arith.cmpf ogt, %5, %41 : vector<1x8xf32>
    %cst_21 = arith.constant -1.000000e+30 : f32
    %43 = vector.shape_cast %42 : vector<1x8xi1> to vector<1x8xi1>
    %44 = vector.broadcast %43 : vector<1x8xi1> to vector<32x8xi1>
    %45 = vector.broadcast %cst_21 : f32 to vector<32x8xf32>
    %46 = arith.select %44, %40, %45 : vector<32x8xi1>, vector<32x8xf32>
    %cst_22 = arith.constant dense<0xFF800000> : vector<32xf32>
    %47 = vector.multi_reduction <maximumf>, %46, %cst_22 [1] : vector<32x8xf32> to vector<32xf32>
    %48 = vector.shape_cast %47 : vector<32xf32> to vector<32x1xf32>
    %49 = vector.broadcast %48 : vector<32x1xf32> to vector<32x8xf32>
    %50 = arith.subf %46, %49 : vector<32x8xf32>
    %51 = math.exp %50 : vector<32x8xf32>
    %52 = vector.broadcast %5 : vector<1x8xf32> to vector<32x8xf32>
    %53 = arith.mulf %51, %52 : vector<32x8xf32>
    %cst_23 = arith.constant dense<0.000000e+00> : vector<32xf32>
    %54 = vector.multi_reduction <add>, %53, %cst_23 [1] : vector<32x8xf32> to vector<32xf32>
    %55 = vector.shape_cast %54 : vector<32xf32> to vector<32x1xf32>
    %cst_24 = arith.constant 0.000000e+00 : f32
    %56 = vector.broadcast %cst_24 : f32 to vector<32x1xf32>
    %57 = arith.cmpf oeq, %55, %56 : vector<32x1xf32>
    %cst_25 = arith.constant 1.000000e+00 : f32
    %58 = vector.broadcast %cst_25 : f32 to vector<32x1xf32>
    %59 = arith.select %57, %58, %55 : vector<32x1xi1>, vector<32x1xf32>
    %60 = tpu.reciprocal %59 {approx = true} : vector<32x1xf32> -> vector<32x1xf32>
    %61 = vector.broadcast %60 : vector<32x1xf32> to vector<32x8xf32>
    %62 = arith.mulf %53, %61 : vector<32x8xf32>
    %63 = arith.truncf %62 : vector<32x8xf32> to vector<32x8xbf16>
    %64 = vector.extract_strided_slice %11 {offsets = [0, 8], sizes = [32, 4], strides = [1, 1]} : vector<32x16xbf16> to vector<32x4xbf16>
    %65 = vector.extract_strided_slice %3 {offsets = [0, 16], sizes = [4, 8], strides = [1, 1]} : vector<4x32xbf16> to vector<4x8xbf16>
    %cst_26 = arith.constant dense<0.000000e+00> : vector<32x8xf32>
    %66 = tpu.matmul %64, %65, %cst_26 {dimension_numbers = #tpu.dot_dimension_numbers<[1], [0], [0], [1], [0, 0, 1, 1], [], []>} : vector<32x4xbf16>, vector<4x8xbf16>, vector<32x8xf32> -> vector<32x8xf32>
    %cst_27 = arith.constant 0.000000e+00 : f32
    %67 = vector.broadcast %cst_27 : f32 to vector<1x8xf32>
    %68 = arith.cmpf ogt, %5, %67 : vector<1x8xf32>
    %cst_28 = arith.constant -1.000000e+30 : f32
    %69 = vector.shape_cast %68 : vector<1x8xi1> to vector<1x8xi1>
    %70 = vector.broadcast %69 : vector<1x8xi1> to vector<32x8xi1>
    %71 = vector.broadcast %cst_28 : f32 to vector<32x8xf32>
    %72 = arith.select %70, %66, %71 : vector<32x8xi1>, vector<32x8xf32>
    %cst_29 = arith.constant dense<0xFF800000> : vector<32xf32>
    %73 = vector.multi_reduction <maximumf>, %72, %cst_29 [1] : vector<32x8xf32> to vector<32xf32>
    %74 = vector.shape_cast %73 : vector<32xf32> to vector<32x1xf32>
    %75 = vector.broadcast %74 : vector<32x1xf32> to vector<32x8xf32>
    %76 = arith.subf %72, %75 : vector<32x8xf32>
    %77 = math.exp %76 : vector<32x8xf32>
    %78 = vector.broadcast %5 : vector<1x8xf32> to vector<32x8xf32>
    %79 = arith.mulf %77, %78 : vector<32x8xf32>
    %cst_30 = arith.constant dense<0.000000e+00> : vector<32xf32>
    %80 = vector.multi_reduction <add>, %79, %cst_30 [1] : vector<32x8xf32> to vector<32xf32>
    %81 = vector.shape_cast %80 : vector<32xf32> to vector<32x1xf32>
    %cst_31 = arith.constant 0.000000e+00 : f32
    %82 = vector.broadcast %cst_31 : f32 to vector<32x1xf32>
    %83 = arith.cmpf oeq, %81, %82 : vector<32x1xf32>
    %cst_32 = arith.constant 1.000000e+00 : f32
    %84 = vector.broadcast %cst_32 : f32 to vector<32x1xf32>
    %85 = arith.select %83, %84, %81 : vector<32x1xi1>, vector<32x1xf32>
    %86 = tpu.reciprocal %85 {approx = true} : vector<32x1xf32> -> vector<32x1xf32>
    %87 = vector.broadcast %86 : vector<32x1xf32> to vector<32x8xf32>
    %88 = arith.mulf %79, %87 : vector<32x8xf32>
    %89 = arith.truncf %88 : vector<32x8xf32> to vector<32x8xbf16>
    %90 = vector.extract_strided_slice %11 {offsets = [0, 12], sizes = [32, 4], strides = [1, 1]} : vector<32x16xbf16> to vector<32x4xbf16>
    %91 = vector.extract_strided_slice %3 {offsets = [0, 24], sizes = [4, 8], strides = [1, 1]} : vector<4x32xbf16> to vector<4x8xbf16>
    %cst_33 = arith.constant dense<0.000000e+00> : vector<32x8xf32>
    %92 = tpu.matmul %90, %91, %cst_33 {dimension_numbers = #tpu.dot_dimension_numbers<[1], [0], [0], [1], [0, 0, 1, 1], [], []>} : vector<32x4xbf16>, vector<4x8xbf16>, vector<32x8xf32> -> vector<32x8xf32>
    %cst_34 = arith.constant 0.000000e+00 : f32
    %93 = vector.broadcast %cst_34 : f32 to vector<1x8xf32>
    %94 = arith.cmpf ogt, %5, %93 : vector<1x8xf32>
    %cst_35 = arith.constant -1.000000e+30 : f32
    %95 = vector.shape_cast %94 : vector<1x8xi1> to vector<1x8xi1>
    %96 = vector.broadcast %95 : vector<1x8xi1> to vector<32x8xi1>
    %97 = vector.broadcast %cst_35 : f32 to vector<32x8xf32>
    %98 = arith.select %96, %92, %97 : vector<32x8xi1>, vector<32x8xf32>
    %cst_36 = arith.constant dense<0xFF800000> : vector<32xf32>
    %99 = vector.multi_reduction <maximumf>, %98, %cst_36 [1] : vector<32x8xf32> to vector<32xf32>
    %100 = vector.shape_cast %99 : vector<32xf32> to vector<32x1xf32>
    %101 = vector.broadcast %100 : vector<32x1xf32> to vector<32x8xf32>
    %102 = arith.subf %98, %101 : vector<32x8xf32>
    %103 = math.exp %102 : vector<32x8xf32>
    %104 = vector.broadcast %5 : vector<1x8xf32> to vector<32x8xf32>
    %105 = arith.mulf %103, %104 : vector<32x8xf32>
    %cst_37 = arith.constant dense<0.000000e+00> : vector<32xf32>
    %106 = vector.multi_reduction <add>, %105, %cst_37 [1] : vector<32x8xf32> to vector<32xf32>
    %107 = vector.shape_cast %106 : vector<32xf32> to vector<32x1xf32>
    %cst_38 = arith.constant 0.000000e+00 : f32
    %108 = vector.broadcast %cst_38 : f32 to vector<32x1xf32>
    %109 = arith.cmpf oeq, %107, %108 : vector<32x1xf32>
    %cst_39 = arith.constant 1.000000e+00 : f32
    %110 = vector.broadcast %cst_39 : f32 to vector<32x1xf32>
    %111 = arith.select %109, %110, %107 : vector<32x1xi1>, vector<32x1xf32>
    %112 = tpu.reciprocal %111 {approx = true} : vector<32x1xf32> -> vector<32x1xf32>
    %113 = vector.broadcast %112 : vector<32x1xf32> to vector<32x8xf32>
    %114 = arith.mulf %105, %113 : vector<32x8xf32>
    %115 = arith.truncf %114 : vector<32x8xf32> to vector<32x8xbf16>
    %116 = tpu.concatenate %37, %63, %89, %115 in 1 : vector<32x8xbf16>, vector<32x8xbf16>, vector<32x8xbf16>, vector<32x8xbf16> -> vector<32x32xbf16>
    %c0_40 = arith.constant 0 : index
    %c0_41 = arith.constant 0 : index
    %c0_42 = arith.constant 0 : index
    %117 = vector.load %arg4[%c0_40, %c0_41, %c0_42] : memref<1x32x12xbf16, #tpu.memory_space<vmem>>, vector<1x32x12xbf16>
    %118 = vector.shape_cast %117 : vector<1x32x12xbf16> to vector<32x12xbf16>
    %cst_43 = arith.constant dense<0.000000e+00> : vector<32x12xf32>
    %119 = tpu.matmul %116, %118, %cst_43 {dimension_numbers = #tpu.dot_dimension_numbers<[1], [0], [0], [1], [0, 0, 1, 1], [], []>} : vector<32x32xbf16>, vector<32x12xbf16>, vector<32x12xf32> -> vector<32x12xf32>
    %120 = arith.extf %1 : vector<32x12xbf16> to vector<32x12xf32>
    %121 = arith.addf %120, %119 : vector<32x12xf32>
    %122 = arith.truncf %121 : vector<32x12xf32> to vector<32x12xbf16>
    %c0_44 = arith.constant 0 : index
    %c0_45 = arith.constant 0 : index
    %123 = vector.load %arg8[%c0_44, %c0_45] : memref<12x12xbf16, #tpu.memory_space<vmem>>, vector<12x12xbf16>
    %cst_46 = arith.constant dense<0.000000e+00> : vector<32x12xf32>
    %124 = tpu.matmul %122, %123, %cst_46 {dimension_numbers = #tpu.dot_dimension_numbers<[1], [0], [0], [1], [0, 0, 1, 1], [], []>} : vector<32x12xbf16>, vector<12x12xbf16>, vector<32x12xf32> -> vector<32x12xf32>
    %c0_47 = arith.constant 0 : index
    %c0_48 = arith.constant 0 : index
    %125 = vector.load %arg9[%c0_47, %c0_48] : memref<1x12xf32, #tpu.memory_space<vmem>>, vector<1x12xf32>
    %126 = vector.broadcast %125 : vector<1x12xf32> to vector<32x12xf32>
    %127 = arith.addf %124, %126 : vector<32x12xf32>
    %cst_49 = arith.constant 0.000000e+00 : f32
    %128 = vector.broadcast %cst_49 : f32 to vector<32x12xf32>
    %129 = arith.maximumf %127, %128 : vector<32x12xf32>
    %130 = arith.truncf %129 : vector<32x12xf32> to vector<32x12xbf16>
    %c0_50 = arith.constant 0 : index
    %c0_51 = arith.constant 0 : index
    %c0_52 = arith.constant 0 : index
    %131 = vector.load %arg10[%c0_50, %c0_51, %c0_52] : memref<1x32x12xbf16, #tpu.memory_space<vmem>>, vector<1x32x12xbf16>
    %132 = vector.shape_cast %131 : vector<1x32x12xbf16> to vector<32x12xbf16>
    %133 = vector.shape_cast %130 : vector<32x12xbf16> to vector<1x32x12xbf16>
    tpu.vector_store %arg10[%c0_50, %c0_51, %c0_52], %133 {strides = array<i32>} : memref<1x32x12xbf16, #tpu.memory_space<vmem>>, vector<1x32x12xbf16>,
    return
  }
  func.func @transform_0(%arg0: i32, %arg1: i32) -> (i32, i32, i32) {
    %c0_i32 = arith.constant 0 : i32
    %c0_i32_0 = arith.constant 0 : i32
    return %arg0, %arg1, %c0_i32 : i32, i32, i32
  }
  func.func @transform_1(%arg0: i32, %arg1: i32) -> (i32, i32, i32) {
    %c0_i32 = arith.constant 0 : i32
    %c0_i32_0 = arith.constant 0 : i32
    %c0_i32_1 = arith.constant 0 : i32
    return %arg0, %c0_i32, %c0_i32_0 : i32, i32, i32
  }
  func.func @transform_2(%arg0: i32, %arg1: i32) -> (i32, i32, i32) {
    %c0_i32 = arith.constant 0 : i32
    %c0_i32_0 = arith.constant 0 : i32
    %c0_i32_1 = arith.constant 0 : i32
    return %arg0, %c0_i32, %c0_i32_0 : i32, i32, i32
  }
  func.func @transform_3(%arg0: i32, %arg1: i32) -> (i32, i32, i32) {
    %c0_i32 = arith.constant 0 : i32
    %c0_i32_0 = arith.constant 0 : i32
    %c0_i32_1 = arith.constant 0 : i32
    return %arg0, %c0_i32, %c0_i32_0 : i32, i32, i32
  }
  func.func @transform_4(%arg0: i32, %arg1: i32) -> (i32, i32) {
    %c0_i32 = arith.constant 0 : i32
    %c0_i32_0 = arith.constant 0 : i32
    %c0_i32_1 = arith.constant 0 : i32
    return %c0_i32, %c0_i32_0 : i32, i32
  }
  func.func @transform_5(%arg0: i32, %arg1: i32) -> (i32, i32) {
    %c0_i32 = arith.constant 0 : i32
    %c0_i32_0 = arith.constant 0 : i32
    %c0_i32_1 = arith.constant 0 : i32
    return %c0_i32, %c0_i32_0 : i32, i32
  }
  func.func @transform_6(%arg0: i32, %arg1: i32) -> (i32, i32) {
    %c0_i32 = arith.constant 0 : i32
    %c0_i32_0 = arith.constant 0 : i32
    %c0_i32_1 = arith.constant 0 : i32
    return %c0_i32, %c0_i32_0 : i32, i32
  }
  func.func @transform_7(%arg0: i32, %arg1: i32) -> (i32, i32) {
    %c0_i32 = arith.constant 0 : i32
    %c0_i32_0 = arith.constant 0 : i32
    %c0_i32_1 = arith.constant 0 : i32
    return %c0_i32, %c0_i32_0 : i32, i32
  }
  func.func @transform_8(%arg0: i32, %arg1: i32) -> (i32, i32, i32) {
    %c0_i32 = arith.constant 0 : i32
    %c0_i32_0 = arith.constant 0 : i32
    return %arg0, %arg1, %c0_i32 : i32, i32, i32
  }
}

</mosaic_0001>

<bundles_post_ra>
// kernel: tpu_custom_call.1
= control target key start
LH: loop header
LB: loop body
LE: loop exit
PB: predicated region body
PF: predicated region fallthrough
CT: control target
= control target key end

     0   :  { %s1683_s27 = smov 0   ;;  %s1685_s28 = smov 0   ;;  %s2001_s0 = inlined_call_operand.vmem [shape: bf16[2,64,12], index: 0, kind: input, shape index: {}]   ;;  %s2002_s1 = inlined_call_operand.vmem [shape: bf16[2,4,32], index: 1, kind: input, shape index: {}]   ;;  %s2003_s2 = inlined_call_operand.vmem [shape: bf16[2,32,12], index: 2, kind: input, shape index: {}]   ;;  %s2004_s3 = inlined_call_operand.vmem [shape: f32[2,1,8], index: 3, kind: input, shape index: {}]   ;;  %s2005_s4 = inlined_call_operand.vmem [shape: bf16[12,16], index: 4, kind: input, shape index: {}]   ;;  %s2006_s5 = inlined_call_operand.vmem [shape: f32[1,16], index: 5, kind: input, shape index: {}]   ;;  %s2007_s6 = inlined_call_operand.vmem [shape: bf16[12,12], index: 6, kind: input, shape index: {}]   ;;  %s2008_s7 = inlined_call_operand.vmem [shape: f32[1,12], index: 7, kind: input, shape index: {}]   ;;  %s2009_s8 = inlined_call_operand.vmem [shape: bf16[2,64,12], index: 8, kind: output, shape index: {}]  }
   0x1   :  { %s1687_s29 = smov 0   ;;  %s1689_s30 = smov 0  }
   0x2   :  { %s1691_s9 = smov 0  }
   0x3 LB: > { %s27_s10 = sadd.s32 1, %s1618_s29  ;;  %s30_s11 = sadd.s32 1, %s1622_s30  ;;  %s1626_s9 = sphi %s1691_s9, %s18_s9   ;;  %s1622_s30 = sphi %s1689_s30, %s2013_s30   ;;  %s1618_s29 = sphi %s1687_s29, %s2012_s29   ;;  %s1614_s28 = sphi %s1685_s28, %s2011_s28   ;;  %s1610_s27 = sphi %s1683_s27, %s2010_s27  }
   0x4   : > { %p28_p0 = scmp.ge.s32.totalorder %s27_s10, 2  ;;  %p1351_p1 = scmp.ge.s32.totalorder %s1626_s9, 1 }
   0x5   : > { %p310_p2 = scmp.lt.s32.totalorder %s1626_s9, 5 }
   0x6   : > { %s2015_s10 = smov (%p28_p0, %s27_s10), 0  ;;  %s2017_s11 = smov (!%p28_p0, %s30_s11), %s1622_s30 }
   0x7   : > { %p311_p3 = pnand %p1351_p1, %p310_p2  ;;  %p32_p4 = scmp.ge.s32.totalorder %s2017_s11, 2 }
   0x8   : > { %s1352_s14 = sshll.u32 (!%p311_p3), %s1610_s27, 2  ;;  %p365_p5 = scmp.lt.s32.totalorder (!%p311_p3), %s1614_s28, 1 }
   0x9   : > { %s2019_s11 = smov (%p32_p4, %s2017_s11), 0  ;;  %314 = sbr.rel (%p311_p3) target bundleno = 1406 (0x57e), region = 52 }
   0xa   : > { %p367_p6 = scmp.lt.s32.totalorder (!%p311_p3), %s1352_s14, 7  ;;  %s1629_s12 = smov (!%p311_p3), 120  }
   0xb   : > { %s1630_s13 = smov (!%p311_p3), 112   ;;  %s1631_s18 = smov (!%p311_p3), 124  }
   0xc   : > { %s1632_s19 = smov (!%p311_p3), 104   ;;  %s1635_s25 = smov (!%p311_p3), 8  }
   0xd   : > { %s1637_s26 = smov (!%p311_p3), 24  }
   0xe   : > { %v1516_v0 = vld [vmem:[%s2005_s4] sm:$0x3f]   ;;  %vm434_vm0 = vcmask 1045504   ;;  %s2021_s28 = smov (!%p365_p5, %s1614_s28), 1  ;;  %s2023_s14 = smov (!%p367_p6, %s1352_s14), 7  ;;  %vm427_vm1 = vcmask 97280   ;;  %v551_v4 = vlaneseq }
   0xf   : > { %1460 = vmatprep.subr.msk.bf16.mxu0 %vm434_vm0, %v1516_v0  ;;  %v436_v1 = vsel %vm434_vm0, %v1516_v0, 0  ;;  %s1353_s15 = sshll.u32 %s2021_s28, 3  ;;  %v1628_v5 = vmov 1983009808   ;;  %s1355_s21 = sshll.u32 %s2021_s28, 1  ;;  %vm496_vm2 = vcmask 1041408  }
  0x10   : > { %1417 = vmatpush3.bf16.msra.mxu0 %v436_v1  ;;  %s1721_s16 = sadd.s32 %s1353_s15, %s2023_s14  ;;  %v633_v6 = vunpack.c.l.s4 %v1628_v5  ;;  %v1737_v7 = vshrl.u32 %v551_v4, 7  ;;  %s377_s24 = scalar_lea.vmem %s2002_s1, %s1355_s21  ;;  %v1361_v20 = vld [vmem:[%s2006_s5] ss:$0 sm:$0xff]  ;;  %vm489_vm3 = vcmask 31744   ;;  %v1634_v39 = vmov 0  }
  0x11   : > { %s1354_s17 = sshll.u32 %s1721_s16, 2  ;;  %v401_v10 = vld [vmem:[%s377_s24] sm:$0x3]  ;;  %s385_s27 = scalar_lea.vmem %s2004_s3, %s2021_s28  ;;  %vm560_vm6 = vcmask 64512  }
  0x12   : > { %s372_s20 = scalar_lea.vmem %s2001_s0, %s1354_s17  ;;  %v634_v8 = vunpack.c.0.s8 %v633_v6  ;;  %v553_v11 = vsub.s32 0, %v1737_v7  ;;  %v402_v13 = vld [vmem:[%s385_s27] sm:$0x1]  ;;  %1461 = vmatprep.subr.msk.bf16.mxu1 %vm496_vm2, %v401_v10  ;;  %v498_v15 = vsel %vm496_vm2, %v401_v10, 0  ;;  %s1389_s21 = sshll.u32 %s2021_s28, 4 }
  0x13   : > { %v1729_v2 = vld [vmem:[%s372_s20] sm:$0xff]   ;;  %v1731_v3 = vld [vmem:[%s372_s20 + $0x8] sm:$0xff]   ;;  %1423 = vmatpush3.bf16.msra.mxu1 %v498_v15  ;;  %s1633_s20 = smov 116   ;;  %vm549_vm4 = vcmp.gt.f32.partialorder %v402_v13, 0.0  ;;  %s382_s24 = scalar_lea.vmem %s2003_s2, %s1389_s21 }
  0x14   : > { %1418 = vmatprep.mubr.msk.bf16.mxu0 %vm427_vm1, %v1729_v2  ;;  %v637_v9 = vsub.s32 %v634_v8, %v1737_v7  ;;  %v1751_v14 = vrot.slane %v402_v13, %v553_v11  ;;  %v550_v40 = vsel %vm549_vm4, 1, %v1634_v39  ;;  %s1636_s28 = smov 16  }
  0x15   : > { %1419 = vmatmul.mubr.msk.bf16.vlgmr.msra.gmra.mxu0 %vm427_vm1, %v1731_v3  ;;  %v554_v42 = vrot.slane %v550_v40, %v553_v11 }
  0x16   : > { %v638_v12 = vrot.slane %v401_v10, %v637_v9 }
  0x17   : > { %vm555_vm5 = vcmp.eq.s32.totalorder %v554_v42, 1 }
  0x18   : > { %639 = vrot.lane.b32.xlu0 %v638_v12, %s1629_s12  ;;  %765 = vrot.lane.b32.xlu1 %v638_v12, %s1630_s13 }
  0x8a   : > { %v640_v16 = vpop.permute.xlu0 %639  ;;  %v766_v17 = vpop.permute.xlu1 %765 }
  0x8b   : > { %v648_v18 = vsel %vm496_vm2, %v640_v16, 0  ;;  %1462 = vmatprep.subr.msk.bf16.mxu0 %vm496_vm2, %v640_v16  ;;  %1463 = vmatprep.subr.msk.bf16.mxu1 %vm496_vm2, %v766_v17  ;;  %v774_v30 = vsel %vm496_vm2, %v766_v17, 0 }
  0x8c   : > { %1429 = vmatpush3.bf16.msra.mxu0 %v648_v18 }
  0xd5   : > { %v1420_v19 = vpop.f32.mrf.mxu0 }
  0xd6   : > { %v481_v23 = vadd.f32 %v1420_v19, %v1361_v20 }
  0xd7   : > { %v472_v21 = vpop.f32.mrf.mxu0 }
  0xd8   : > { %v473_v26 = vadd.f32 %v1361_v20, %v472_v21 }
  0xd9   : > { %v1421_v22 = vpop.f32.mrf.mxu0 }
  0xda   : > { %v484_v24 = vadd.f32 %v1421_v22, %v1361_v20 }
  0xdb   : > { %v475_v25 = vpop.f32.mrf.mxu0 }
  0xdc   : > { %v488_v27 = vpack.c.bf16 %v484_v24, %v481_v23  ;;  %v476_v28 = vadd.f32 %v1361_v20, %v475_v25 }
  0xde   : > { %v487_v29 = vpack.c.bf16 %v476_v28, %v473_v26  ;;  %629 = vrot.lane.b32.xlu1 %v488_v27, %s1631_s18 }
  0xe0   : > { %627 = vrot.lane.b32.xlu0 %v487_v29, %s1631_s18  ;;  %1424 = vmatprep.mubr.msk.bf16.mxu1 %vm489_vm3, %v487_v29 }
  0xe1   : > { %1425 = vmatmul.mubr.msk.bf16.vlgmr.msra.gmra.mxu1 %vm489_vm3, %v488_v27 }
  0xe2   : > { %761 = vrot.lane.b32.xlu1 %v487_v29, %s1629_s12  ;;  %1435 = vmatpush3.bf16.msra.mxu1 %v774_v30 }
  0xe4   : > { %891 = vrot.lane.b32.xlu0 %v638_v12, %s1632_s19  ;;  %s394_s19 = scalar_lea.vmem %s2009_s8, %s1354_s17 }
  0xe6   : > { %887 = vrot.lane.b32.xlu1 %v487_v29, %s1633_s20 }
  0xe8   : > { %763 = vrot.lane.b32.xlu0 %v488_v27, %s1629_s12 }
  0xec   : > { %889 = vrot.lane.b32.xlu0 %v488_v27, %s1633_s20 }
 0x150   : > { %v630_v31 = vpop.permute.xlu1 %629 }
 0x152   : > { %v628_v32 = vpop.permute.xlu0 %627 }
 0x153   : > { %1430 = vmatprep.mubr.msk.bf16.mxu0 %vm489_vm3, %v628_v32 }
 0x154   : > { %v762_v33 = vpop.permute.xlu1 %761  ;;  %1431 = vmatmul.mubr.msk.bf16.vlgmr.msra.gmra.mxu0 %vm489_vm3, %v630_v31 }
 0x155   : > { %1436 = vmatprep.mubr.msk.bf16.mxu1 %vm489_vm3, %v762_v33 }
 0x156   : > { %v892_v34 = vpop.permute.xlu0 %891 }
 0x157   : > { %v900_v35 = vsel %vm496_vm2, %v892_v34, 0  ;;  %1464 = vmatprep.subr.msk.bf16.mxu0 %vm496_vm2, %v892_v34 }
 0x158   : > { %v888_v36 = vpop.permute.xlu1 %887  ;;  %1441 = vmatpush3.bf16.msra.mxu0 %v900_v35 }
 0x159   : > { %1442 = vmatprep.mubr.msk.bf16.mxu0 %vm489_vm3, %v888_v36 }
 0x15a   : > { %v764_v37 = vpop.permute.xlu0 %763 }
 0x15b   : > { %1437 = vmatmul.mubr.msk.bf16.vlgmr.msra.gmra.mxu1 %vm489_vm3, %v764_v37 }
 0x15e   : > { %v890_v38 = vpop.permute.xlu0 %889 }
 0x15f   : > { %1443 = vmatmul.mubr.msk.bf16.vlgmr.msra.gmra.mxu0 %vm489_vm3, %v890_v38 }
 0x1a1   : > { %v1426_v41 = vpop.f32.mrf.mxu1 }
 0x1a2   : > { %v1842_v25 = vsel %vm555_vm5, %v1426_v41, -1e+30 }
 0x1a3   : > { %v534_v43 = vpop.f32.mrf.mxu1  ;;  %v567_v27 = vsel %vm560_vm6, %v1842_v25, -inf }
 0x1a4   : > { %v1832_v21 = vsel %vm555_vm5, %v534_v43, -1e+30 }
 0x1a5   : > { %v1427_v45 = vpop.f32.mrf.mxu1  ;;  %v561_v23 = vsel %vm560_vm6, %v1832_v21, -inf }
 0x1a6   : > { %v1845_v26 = vsel %vm555_vm5, %v1427_v45, -1e+30 }
 0x1a7   : > { %v537_v52 = vpop.f32.mrf.mxu1  ;;  %v570_v28 = vsel %vm560_vm6, %v1845_v26, -inf }
 0x1a8   : > { %v1835_v22 = vsel %vm555_vm5, %v537_v52, -1e+30 }
 0x1a9   : > { %v564_v24 = vsel %vm560_vm6, %v1835_v22, -inf }
 0x214   : > { %v1432_v44 = vpop.f32.mrf.mxu0 }
 0x215   : > { %v1778_v46 = vsel %vm555_vm5, %v1432_v44, -1e+30 }
 0x216   : > { %v684_v47 = vpop.f32.mrf.mxu0  ;;  %v709_v48 = vsel %vm560_vm6, %v1778_v46, -inf }
 0x217   : > { %v1783_v49 = vsel %vm555_vm5, %v684_v47, -1e+30  ;;  %710 = vmax.xlane.f32.xlu0 %v709_v48 }
 0x218   : > { %v1433_v50 = vpop.f32.mrf.mxu0  ;;  %v703_v51 = vsel %vm560_vm6, %v1783_v49, -inf }
 0x219   : > { %v1788_v53 = vsel %vm555_vm5, %v1433_v50, -1e+30  ;;  %704 = vmax.xlane.f32.xlu1 %v703_v51 }
 0x21a   : > { %v712_v56 = vsel %vm560_vm6, %v1788_v53, -inf  ;;  %v687_v57 = vpop.f32.mrf.mxu0 }
 0x21b   : > { %v1438_v54 = vpop.f32.mrf.mxu1  ;;  %v1802_v6 = vsel %vm555_vm5, %v687_v57, -1e+30 }
 0x21c   : > { %v827_v55 = vsel %vm555_vm5, %v1438_v54, -1e+30  ;;  %v706_v10 = vsel %vm560_vm6, %v1802_v6, -inf }
 0x21d   : > { %713 = vmax.xlane.f32.xlu1 %v712_v56  ;;  %v810_v58 = vpop.f32.mrf.mxu1  ;;  %v835_v59 = vsel %vm560_vm6, %v827_v55, -inf }
 0x21e   : > { %v1795_v60 = vsel %vm555_vm5, %v810_v58, -1e+30  ;;  %836 = vmax.xlane.f32.xlu0 %v835_v59 }
 0x21f   : > { %v1439_v61 = vpop.f32.mrf.mxu1  ;;  %v1444_v62 = vpop.f32.mrf.mxu0  ;;  %v829_v4 = vsel %vm560_vm6, %v1795_v60, -inf }
 0x220   : > { %v828_v63 = vsel %vm555_vm5, %v1439_v61, -1e+30  ;;  %v1822_v17 = vsel %vm555_vm5, %v1444_v62, -1e+30 }
 0x221   : > { %v813_v0 = vpop.f32.mrf.mxu1  ;;  %v936_v1 = vpop.f32.mrf.mxu0  ;;  %v838_v5 = vsel %vm560_vm6, %v828_v63, -inf  ;;  %v961_v19 = vsel %vm560_vm6, %v1822_v17, -inf }
 0x222   : > { %v1805_v7 = vsel %vm555_vm5, %v813_v0, -1e+30  ;;  %830 = vmax.xlane.f32.xlu0 %v829_v4  ;;  %839 = vmax.xlane.f32.xlu1 %v838_v5  ;;  %v1812_v12 = vsel %vm555_vm5, %v936_v1, -1e+30 }
 0x223   : > { %v1445_v8 = vpop.f32.mrf.mxu0  ;;  %v832_v11 = vsel %vm560_vm6, %v1805_v7, -inf  ;;  %v955_v15 = vsel %vm560_vm6, %v1812_v12, -inf }
 0x224   : > { %v1825_v18 = vsel %vm555_vm5, %v1445_v8, -1e+30 }
 0x225   : > { %v939_v9 = vpop.f32.mrf.mxu0  ;;  %v964_v20 = vsel %vm560_vm6, %v1825_v18, -inf }
 0x226   : > { %v1815_v13 = vsel %vm555_vm5, %v939_v9, -1e+30  ;;  %707 = vmax.xlane.f32.xlu0 %v706_v10  ;;  %833 = vmax.xlane.f32.xlu1 %v832_v11 }
 0x227   : > { %v958_v16 = vsel %vm560_vm6, %v1815_v13, -inf }
 0x22a   : > { %956 = vmax.xlane.f32.xlu0 %v955_v15  ;;  %959 = vmax.xlane.f32.xlu1 %v958_v16 }
 0x22e   : > { %962 = vmax.xlane.f32.xlu0 %v961_v19  ;;  %965 = vmax.xlane.f32.xlu1 %v964_v20 }
 0x232   : > { %562 = vmax.xlane.f32.xlu0 %v561_v23  ;;  %565 = vmax.xlane.f32.xlu1 %v564_v24 }
 0x236   : > { %568 = vmax.xlane.f32.xlu0 %v567_v27  ;;  %571 = vmax.xlane.f32.xlu1 %v570_v28 }
 0x2a0   : > { %v711_v29 = vpop.xlane.xlu0 %710 }
 0x2a1   : > { %v717_v30 = vsub.f32 %v1778_v46, %v711_v29 }
 0x2a2   : > { %v705_v31 = vpop.xlane.xlu1 %704 }
 0x2a3   : > { %v723_v32 = vmul.f32 1.442695, %v717_v30  ;;  %v715_v33 = vsub.f32 %v1783_v49, %v705_v31 }
 0x2a5   : > { %1524 = vpow2.f32 %v723_v32  ;;  %v719_v34 = vmul.f32 1.442695, %v715_v33 }
 0x2a6   : > { %v714_v35 = vpop.xlane.xlu1 %713 }
 0x2a7   : > { %v718_v36 = vsub.f32 %v1788_v53, %v714_v35  ;;  %v837_v37 = vpop.xlane.xlu0 %836  ;;  %1526 = vpow2.f32 %v719_v34 }
 0x2a8   : > { %v843_v38 = vsub.f32 %v827_v55, %v837_v37 }
 0x2a9   : > { %v725_v39 = vmul.f32 1.442695, %v718_v36 }
 0x2aa   : > { %v849_v40 = vmul.f32 1.442695, %v843_v38 }
 0x2ab   : > { %1528 = vpow2.f32 %v725_v39  ;;  %v831_v41 = vpop.xlane.xlu0 %830  ;;  %v840_v42 = vpop.xlane.xlu1 %839 }
 0x2ac   : > { %1530 = vpow2.f32 %v849_v40  ;;  %v841_v43 = vsub.f32 %v1795_v60, %v831_v41  ;;  %v844_v44 = vsub.f32 %v828_v63, %v840_v42 }
 0x2ae   : > { %v845_v45 = vmul.f32 1.442695, %v841_v43  ;;  %v851_v46 = vmul.f32 1.442695, %v844_v44 }
 0x2af   : > { %v708_v47 = vpop.xlane.xlu0 %707  ;;  %v834_v48 = vpop.xlane.xlu1 %833 }
 0x2b0   : > { %1532 = vpow2.f32 %v845_v45  ;;  %v716_v49 = vsub.f32 %v1802_v6, %v708_v47  ;;  %v842_v50 = vsub.f32 %v1805_v7, %v834_v48 }
 0x2b1   : > { %1534 = vpow2.f32 %v851_v46 }
 0x2b2   : > { %v1525_v51 = vpop.eup %1524  ;;  %v721_v52 = vmul.f32 1.442695, %v716_v49  ;;  %v847_v53 = vmul.f32 1.442695, %v842_v50 }
 0x2b3   : > { %v957_v54 = vpop.xlane.xlu0 %956  ;;  %v960_v55 = vpop.xlane.xlu1 %959  ;;  %v1858_v56 = vmul.f32 %v1525_v51, %v1751_v14 }
 0x2b4   : > { %1536 = vpow2.f32 %v721_v52  ;;  %v967_v57 = vsub.f32 %v1812_v12, %v957_v54  ;;  %v968_v58 = vsub.f32 %v1815_v13, %v960_v55  ;;  %v1527_v62 = vpop.eup %1526 }
 0x2b5   : > { %1538 = vpow2.f32 %v847_v53  ;;  %v737_v59 = vsel %vm560_vm6, %v1858_v56, 0.0  ;;  %v1875_v15 = vmul.f32 %v1527_v62, %v1751_v14 }
 0x2b6   : > { %v971_v60 = vmul.f32 1.442695, %v967_v57  ;;  %v973_v61 = vmul.f32 1.442695, %v968_v58  ;;  %738 = vadd.xlane.f32.xlu0 %v737_v59 }
 0x2b7   : > { %v963_v63 = vpop.xlane.xlu0 %962  ;;  %v966_v0 = vpop.xlane.xlu1 %965  ;;  %v731_v29 = vsel %vm560_vm6, %v1875_v15, 0.0 }
 0x2b8   : > { %v1529_v1 = vpop.eup %1528  ;;  %1540 = vpow2.f32 %v971_v60  ;;  %v969_v4 = vsub.f32 %v1822_v17, %v963_v63  ;;  %v970_v5 = vsub.f32 %v1825_v18, %v966_v0 }
 0x2b9   : > { %v1531_v6 = vpop.eup %1530  ;;  %1542 = vpow2.f32 %v973_v61  ;;  %v1867_v7 = vmul.f32 %v1529_v1, %v1751_v14 }
 0x2ba   : > { %v975_v8 = vmul.f32 1.442695, %v969_v4  ;;  %v977_v9 = vmul.f32 1.442695, %v970_v5  ;;  %v1870_v10 = vmul.f32 %v1531_v6, %v1751_v14 }
 0x2bb   : > { %v563_v11 = vpop.xlane.xlu0 %562  ;;  %v566_v12 = vpop.xlane.xlu1 %565  ;;  %v740_v13 = vsel %vm560_vm6, %v1867_v7, 0.0 }
 0x2bc   : > { %1544 = vpow2.f32 %v975_v8  ;;  %v573_v16 = vsub.f32 %v1832_v21, %v563_v11  ;;  %v574_v17 = vsub.f32 %v1835_v22, %v566_v12  ;;  %741 = vadd.xlane.f32.xlu1 %v740_v13  ;;  %v863_v18 = vsel %vm560_vm6, %v1870_v10, 0.0 }
 0x2bd   : > { %v1533_v19 = vpop.eup %1532  ;;  %1546 = vpow2.f32 %v977_v9  ;;  %864 = vadd.xlane.f32.xlu0 %v863_v18 }
 0x2be   : > { %v1535_v20 = vpop.eup %1534  ;;  %v577_v23 = vmul.f32 1.442695, %v573_v16  ;;  %v579_v24 = vmul.f32 1.442695, %v574_v17  ;;  %v1889_v31 = vmul.f32 %v1533_v19, %v1751_v14 }
 0x2bf   : > { %v569_v27 = vpop.xlane.xlu0 %568  ;;  %v572_v28 = vpop.xlane.xlu1 %571  ;;  %v1884_v30 = vmul.f32 %v1535_v20, %v1751_v14 }
 0x2c0   : > { %1548 = vpow2.f32 %v577_v23  ;;  %v575_v21 = vsub.f32 %v1842_v25, %v569_v27  ;;  %v576_v22 = vsub.f32 %v1845_v26, %v572_v28  ;;  %v857_v25 = vsel %vm560_vm6, %v1889_v31, 0.0 }
 0x2c1   : > { %v1537_v32 = vpop.eup %1536  ;;  %1550 = vpow2.f32 %v579_v24  ;;  %732 = vadd.xlane.f32.xlu0 %v731_v29  ;;  %v866_v33 = vsel %vm560_vm6, %v1884_v30, 0.0 }
 0x2c2   : > { %v1539_v34 = vpop.eup %1538  ;;  %v581_v35 = vmul.f32 1.442695, %v575_v21  ;;  %v583_v36 = vmul.f32 1.442695, %v576_v22  ;;  %867 = vadd.xlane.f32.xlu1 %v866_v33  ;;  %v1894_v37 = vmul.f32 %v1537_v32, %v1751_v14 }
 0x2c3   : > { %v1901_v39 = vmul.f32 %v1539_v34, %v1751_v14 }
 0x2c4   : > { %1552 = vpow2.f32 %v581_v35  ;;  %v734_v26 = vsel %vm560_vm6, %v1894_v37, 0.0 }
 0x2c5   : > { %v1541_v38 = vpop.eup %1540  ;;  %1554 = vpow2.f32 %v583_v36  ;;  %858 = vadd.xlane.f32.xlu0 %v857_v25  ;;  %v860_v44 = vsel %vm560_vm6, %v1901_v39, 0.0 }
 0x2c6   : > { %v1543_v40 = vpop.eup %1542  ;;  %735 = vadd.xlane.f32.xlu1 %v734_v26  ;;  %v1904_v41 = vmul.f32 %v1541_v38, %v1751_v14  ;;  %v1519_v26 = vld [vmem:[%s382_s24 + $0x8] sm:$0xff]  }
 0x2c7   : > { %v1911_v45 = vmul.f32 %v1543_v40, %v1751_v14  ;;  %1446 = vmatprep.subr.bf16.mxu1 %v1519_v26 }
 0x2c8   : > { %v983_v42 = vsel %vm560_vm6, %v1904_v41, 0.0  ;;  %1447 = vmatpush3.bf16.msra.mxu1 %v1519_v26  ;;  %v1120_v26 = vunpack.c.h.bf16 %v1731_v3 }
 0x2c9   : > { %v1545_v43 = vpop.eup %1544  ;;  %984 = vadd.xlane.f32.xlu0 %v983_v42  ;;  %v986_v50 = vsel %vm560_vm6, %v1911_v45, 0.0 }
 0x2ca   : > { %v1547_v46 = vpop.eup %1546  ;;  %861 = vadd.xlane.f32.xlu1 %v860_v44  ;;  %v1914_v47 = vmul.f32 %v1545_v43, %v1751_v14 }
 0x2cb   : > { %v1921_v51 = vmul.f32 %v1547_v46, %v1751_v14  ;;  %v1520_v46 = vld [vmem:[%s382_s24] sm:$0xff]  }
 0x2cc   : > { %v989_v48 = vsel %vm560_vm6, %v1914_v47, 0.0  ;;  %1448 = vmatprep.subr.bf16.mxu1 %v1520_v46 }
 0x2cd   : > { %v1549_v49 = vpop.eup %1548  ;;  %990 = vadd.xlane.f32.xlu0 %v989_v48  ;;  %v992_v57 = vsel %vm560_vm6, %v1921_v51, 0.0  ;;  %1449 = vmatpush3.bf16.msra.mxu1 %v1520_v46 }
 0x2ce   : > { %v1551_v52 = vpop.eup %1550  ;;  %987 = vadd.xlane.f32.xlu1 %v986_v50  ;;  %v1924_v53 = vmul.f32 %v1549_v49, %v1751_v14 }
 0x2cf   : > { %v1931_v58 = vmul.f32 %v1551_v52, %v1751_v14 }
 0x2d0   : > { %v595_v54 = vsel %vm560_vm6, %v1924_v53, 0.0 }
 0x2d1   : > { %v1553_v55 = vpop.eup %1552  ;;  %596 = vadd.xlane.f32.xlu0 %v595_v54  ;;  %v598_v62 = vsel %vm560_vm6, %v1931_v58, 0.0 }
 0x2d2   : > { %v1555_v59 = vpop.eup %1554  ;;  %993 = vadd.xlane.f32.xlu1 %v992_v57  ;;  %v1934_v60 = vmul.f32 %v1553_v55, %v1751_v14 }
 0x2d3   : > { %v1941_v63 = vmul.f32 %v1555_v59, %v1751_v14 }
 0x2d4   : > { %v601_v61 = vsel %vm560_vm6, %v1934_v60, 0.0 }
 0x2d5   : > { %602 = vadd.xlane.f32.xlu0 %v601_v61  ;;  %v604_v0 = vsel %vm560_vm6, %v1941_v63, 0.0 }
 0x2d6   : > { %599 = vadd.xlane.f32.xlu1 %v598_v62 }
 0x2da   : > { %605 = vadd.xlane.f32.xlu1 %v604_v0 }
 0x33f   : > { %v739_v1 = vpop.xlane.xlu0 %738 }
 0x340   : > { %vm745_vm7 = vcmp.eq.f32.partialorder %v739_v1, 0.0 }
 0x341   : > { %v749_v4 = vsel %vm745_vm7, 1.0, %v739_v1 }
 0x342   : > { %1556 = vrcp.f32 %v749_v4 }
 0x345   : > { %v742_v5 = vpop.xlane.xlu1 %741 }
 0x346   : > { %vm746_vm8 = vcmp.eq.f32.partialorder %v742_v5, 0.0  ;;  %v865_v6 = vpop.xlane.xlu0 %864 }
 0x347   : > { %v750_v8 = vsel %vm746_vm8, 1.0, %v742_v5  ;;  %vm871_vm9 = vcmp.eq.f32.partialorder %v865_v6, 0.0 }
 0x348   : > { %1558 = vrcp.f32 %v750_v8  ;;  %v875_v9 = vsel %vm871_vm9, 1.0, %v865_v6 }
 0x349   : > { %1560 = vrcp.f32 %v875_v9 }
 0x34a   : > { %v733_v11 = vpop.xlane.xlu0 %732 }
 0x34b   : > { %vm743_vm10 = vcmp.eq.f32.partialorder %v733_v11, 0.0  ;;  %v868_v14 = vpop.xlane.xlu1 %867 }
 0x34c   : > { %vm872_vm11 = vcmp.eq.f32.partialorder %v868_v14, 0.0  ;;  %v747_v12 = vsel %vm743_vm10, 1.0, %v733_v11  ;;  %vm1042_vm10 = vcmask 195584  }
 0x34d   : > { %v876_v13 = vsel %vm872_vm11, 1.0, %v868_v14  ;;  %vm1037_vm11 = vcmask 130048  }
 0x34e   : > { %1562 = vrcp.f32 %v876_v13  ;;  %v859_v16 = vpop.xlane.xlu0 %858 }
 0x34f   : > { %vm869_vm12 = vcmp.eq.f32.partialorder %v859_v16, 0.0  ;;  %v736_v17 = vpop.xlane.xlu1 %735  ;;  %1564 = vrcp.f32 %v747_v12  ;;  %v1557_v23 = vpop.eup %1556 }
 0x350   : > { %vm744_vm13 = vcmp.eq.f32.partialorder %v736_v17, 0.0  ;;  %v873_v18 = vsel %vm869_vm12, 1.0, %v859_v16  ;;  %v757_v22 = vmul.f32 %v1557_v23, %v1858_v56  ;;  %vm1063_vm12 = vcmask 261120  }
 0x351   : > { %v748_v19 = vsel %vm744_vm13, 1.0, %v736_v17 }
 0x352   : > { %1566 = vrcp.f32 %v748_v19  ;;  %v985_v20 = vpop.xlane.xlu0 %984 }
 0x353   : > { %vm995_vm14 = vcmp.eq.f32.partialorder %v985_v20, 0.0  ;;  %v862_v24 = vpop.xlane.xlu1 %861  ;;  %1568 = vrcp.f32 %v873_v18 }
 0x354   : > { %vm870_vm15 = vcmp.eq.f32.partialorder %v862_v24, 0.0  ;;  %v999_v28 = vsel %vm995_vm14, 1.0, %v985_v20 }
 0x355   : > { %v1559_v27 = vpop.eup %1558  ;;  %v874_v29 = vsel %vm870_vm15, 1.0, %v862_v24 }
 0x356   : > { %1570 = vrcp.f32 %v874_v29  ;;  %v991_v21 = vpop.xlane.xlu0 %990  ;;  %v758_v32 = vmul.f32 %v1559_v27, %v1867_v7  ;;  %v1561_v35 = vpop.eup %1560 }
 0x357   : > { %vm997_vm2 = vcmp.eq.f32.partialorder %v991_v21, 0.0  ;;  %v988_v33 = vpop.xlane.xlu1 %987  ;;  %1572 = vrcp.f32 %v999_v28  ;;  %v883_v7 = vmul.f32 %v1561_v35, %v1870_v10 }
 0x358   : > { %vm996_vm3 = vcmp.eq.f32.partialorder %v988_v33, 0.0  ;;  %v760_v34 = vpack.c.bf16 %v758_v32, %v757_v22  ;;  %v1001_v36 = vsel %vm997_vm2, 1.0, %v991_v21 }
 0x359   : > { %v1000_v25 = vsel %vm996_vm3, 1.0, %v988_v33 }
 0x35a   : > { %1574 = vrcp.f32 %v1000_v25  ;;  %1017 = vrot.lane.b32.xlu1 %v760_v34, %s1635_s25  ;;  %v597_v6 = vpop.xlane.xlu0 %596 }
 0x35b   : > { %v1563_v56 = vpop.eup %1562  ;;  %v994_v38 = vpop.xlane.xlu1 %993  ;;  %1576 = vrcp.f32 %v1001_v36  ;;  %vm607_vm7 = vcmp.eq.f32.partialorder %v597_v6, 0.0 }
 0x35c   : > { %vm998_vm4 = vcmp.eq.f32.partialorder %v994_v38, 0.0  ;;  %v884_v40 = vmul.f32 %v1563_v56, %v1884_v30  ;;  %v1565_v42 = vpop.eup %1564  ;;  %v1117_v56 = vunpack.c.l.bf16 %v1729_v2 }
 0x35d   : > { %v1002_v43 = vsel %vm998_vm4, 1.0, %v994_v38  ;;  %v755_v49 = vmul.f32 %v1565_v42, %v1875_v15  ;;  %v1118_v38 = vunpack.c.h.bf16 %v1729_v2 }
 0x35e   : > { %1578 = vrcp.f32 %v1002_v43  ;;  %v886_v44 = vpack.c.bf16 %v884_v40, %v883_v7  ;;  %v603_v9 = vpop.xlane.xlu0 %602  ;;  %v1119_v7 = vunpack.c.l.bf16 %v1731_v3 }
 0x35f   : > { %v1567_v48 = vpop.eup %1566  ;;  %vm609_vm9 = vcmp.eq.f32.partialorder %v603_v9, 0.0 }
 0x360   : > { %1023 = vrot.lane.b32.xlu0 %v886_v44, %s1636_s28  ;;  %v756_v50 = vmul.f32 %v1567_v48, %v1894_v37  ;;  %v1569_v52 = vpop.eup %1568  ;;  %v613_v14 = vsel %vm609_vm9, 1.0, %v603_v9 }
 0x361   : > { %v881_v30 = vmul.f32 %v1569_v52, %v1889_v31  ;;  %v1379_v52 = vld [vmem:[%s2008_s7] ss:$0 sm:$0xff] }
 0x362   : > { %v759_v10 = vpack.c.bf16 %v756_v50, %v755_v49 }
 0x363   : > { %v1571_v54 = vpop.eup %1570 }
 0x364   : > { %1015 = vrot.lane.b32.xlu0 %v759_v10, %s1635_s25  ;;  %v882_v55 = vmul.f32 %v1571_v54, %v1901_v39  ;;  %v1573_v57 = vpop.eup %1572  ;;  %v600_v39 = vpop.xlane.xlu1 %599 }
 0x365   : > { %v1007_v62 = vmul.f32 %v1573_v57, %v1904_v41  ;;  %vm608_vm5 = vcmp.eq.f32.partialorder %v600_v39, 0.0 }
 0x366   : > { %v885_v59 = vpack.c.bf16 %v882_v55, %v881_v30  ;;  %v612_v41 = vsel %vm608_vm5, 1.0, %v600_v39 }
 0x367   : > { %v1575_v61 = vpop.eup %1574  ;;  %1580 = vrcp.f32 %v612_v41 }
 0x368   : > { %1021 = vrot.lane.b32.xlu1 %v885_v59, %s1636_s28  ;;  %v1008_v15 = vmul.f32 %v1575_v61, %v1911_v45  ;;  %v1577_v0 = vpop.eup %1576  ;;  %v606_v8 = vpop.xlane.xlu1 %605  ;;  %v611_v45 = vsel %vm607_vm7, 1.0, %v597_v6 }
 0x369   : > { %v1009_v4 = vmul.f32 %v1577_v0, %v1914_v47  ;;  %vm610_vm8 = vcmp.eq.f32.partialorder %v606_v8, 0.0  ;;  %1582 = vrcp.f32 %v611_v45 }
 0x36a   : > { %v1011_v37 = vpack.c.bf16 %v1008_v15, %v1007_v62  ;;  %v614_v11 = vsel %vm610_vm8, 1.0, %v606_v8 }
 0x36b   : > { %v1579_v1 = vpop.eup %1578  ;;  %1584 = vrcp.f32 %v614_v11 }
 0x36c   : > { %1027 = vrot.lane.b32.xlu1 %v1011_v37, %s1637_s26  ;;  %v1010_v5 = vmul.f32 %v1579_v1, %v1921_v51  ;;  %1586 = vrcp.f32 %v613_v14 }
 0x36e   : > { %v1012_v31 = vpack.c.bf16 %v1010_v5, %v1009_v4 }
 0x370   : > { %1029 = vrot.lane.b32.xlu0 %v1012_v31, %s1637_s26 }
 0x374   : > { %v1581_v47 = vpop.eup %1580 }
 0x375   : > { %v620_v16 = vmul.f32 %v1581_v47, %v1931_v58 }
 0x376   : > { %v1583_v12 = vpop.eup %1582 }
 0x377   : > { %v619_v18 = vmul.f32 %v1583_v12, %v1924_v53 }
 0x378   : > { %v1585_v17 = vpop.eup %1584 }
 0x379   : > { %v1587_v19 = vpop.eup %1586  ;;  %v622_v24 = vmul.f32 %v1585_v17, %v1941_v63  ;;  %v623_v27 = vpack.c.bf16 %v620_v16, %v619_v18  ;;  %v1521_v63 = vld [vmem:[%s2007_s6] sm:$0x3f]  }
 0x37a   : > { %v621_v28 = vmul.f32 %v1587_v19, %v1934_v60  ;;  %1465 = vmatprep.subr.msk.bf16.mxu0 %vm434_vm0, %v1521_v63  ;;  %v1148_v60 = vsel %vm434_vm0, %v1521_v63, 0  ;;  %vm1219_vm0 = vcmask 93184  }
 0x37b   : > { %1455 = vmatpush3.bf16.msra.mxu0 %v1148_v60 }
 0x37c   : > { %v624_v32 = vpack.c.bf16 %v622_v24, %v621_v28 }
 0x3cc   : > { %v1018_v13 = vpop.permute.xlu1 %1017 }
 0x3cd   : > { %v1036_v53 = vsel %vm560_vm6, %v624_v32, %v1018_v13 }
 0x3d2   : > { %v1024_v51 = vpop.permute.xlu0 %1023 }
 0x3d3   : > { %v1041_v33 = vsel %vm1037_vm11, %v1036_v53, %v1024_v51 }
 0x3d6   : > { %v1016_v20 = vpop.permute.xlu0 %1015 }
 0x3d7   : > { %v1033_v29 = vsel %vm560_vm6, %v623_v27, %v1016_v20 }
 0x3da   : > { %v1022_v23 = vpop.permute.xlu1 %1021 }
 0x3db   : > { %v1039_v21 = vsel %vm1037_vm11, %v1033_v29, %v1022_v23 }
 0x3de   : > { %v1028_v22 = vpop.permute.xlu1 %1027 }
 0x3df   : > { %v1044_v58 = vsel %vm1042_vm10, %v1039_v21, %v1028_v22 }
 0x3e0   : > { %1450 = vmatprep.mubr.msk.bf16.mxu1 %vm1063_vm12, %v1044_v58 }
 0x3e2   : > { %v1030_v34 = vpop.permute.xlu0 %1029 }
 0x3e3   : > { %v1046_v35 = vsel %vm1042_vm10, %v1041_v33, %v1030_v34 }
 0x3e4   : > { %1451 = vmatmul.mubr.msk.bf16.vlgmr.msra.gmra.mxu1 %vm1063_vm12, %v1046_v35 }
 0x4a4   : > { %v1452_v36 = vpop.f32.mrf.mxu1 }
 0x4a5   : > { %v1123_v48 = vadd.f32 %v1452_v36, %v1119_v7 }
 0x4a6   : > { %v1102_v25 = vpop.f32.mrf.mxu1 }
 0x4a7   : > { %v1121_v44 = vadd.f32 %v1117_v56, %v1102_v25 }
 0x4a8   : > { %v1453_v40 = vpop.f32.mrf.mxu1 }
 0x4a9   : > { %v1124_v42 = vadd.f32 %v1453_v40, %v1120_v26 }
 0x4aa   : > { %v1105_v43 = vpop.f32.mrf.mxu1 }
 0x4ab   : > { %v1122_v46 = vadd.f32 %v1118_v38, %v1105_v43  ;;  %v1126_v50 = vpack.c.bf16 %v1124_v42, %v1123_v48 }
 0x4ad   : > { %v1125_v49 = vpack.c.bf16 %v1122_v46, %v1121_v44 }
 0x4af   : > { %1456 = vmatprep.mubr.msk.bf16.mxu0 %vm427_vm1, %v1125_v49 }
 0x4b0   : > { %1457 = vmatmul.mubr.msk.bf16.vlgmr.msra.gmra.mxu0 %vm427_vm1, %v1126_v50 }
 0x570   : > { %v1458_v2 = vpop.f32.mrf.mxu0 }
 0x571   : > { %v1193_v10 = vadd.f32 %v1458_v2, %v1379_v52 }
 0x572   : > { %v1184_v3 = vpop.f32.mrf.mxu0 }
 0x573   : > { %v1201_v54 = vmax.f32 %v1193_v10, 0.0  ;;  %v1185_v30 = vadd.f32 %v1379_v52, %v1184_v3 }
 0x574   : > { %v1459_v55 = vpop.f32.mrf.mxu0 }
 0x575   : > { %v1392_v57 = vpack.c.bf16 %v1201_v54, %v1201_v54  ;;  %v1199_v59 = vmax.f32 %v1185_v30, 0.0  ;;  %v1196_v61 = vadd.f32 %v1459_v55, %v1379_v52 }
 0x576   : > { %v1187_v62 = vpop.f32.mrf.mxu0 }
 0x577   : > { %1222 = vst.msk [vmem:[%s394_s19 + $0x8] sm:$0xf] %vm1219_vm0, %v1392_v57  ;;  %v1390_v15 = vpack.c.bf16 %v1199_v59, %v1199_v59  ;;  %v1202_v0 = vmax.f32 %v1196_v61, 0.0  ;;  %v1188_v37 = vadd.f32 %v1379_v52, %v1187_v62 }
 0x579   : > { %1220 = vst.msk [vmem:[%s394_s19] sm:$0xf] %vm1219_vm0, %v1390_v15  ;;  %v1393_v1 = vpack.c.bf16 %v1202_v0, %v1202_v0  ;;  %v1200_v4 = vmax.f32 %v1188_v37, 0.0 }
 0x57b   : > { %1223 = vst.msk [vmem:[%s394_s19 + $0xc] sm:$0xf] %vm1219_vm0, %v1393_v1  ;;  %v1391_v5 = vpack.c.bf16 %v1200_v4, %v1200_v4 }
 0x57d   : > { %1221 = vst.msk [vmem:[%s394_s19 + $0x4] sm:$0xf] %vm1219_vm0, %v1391_v5 }
 0x57e PF: > { %s18_s9 = sadd.s32 1, %s1626_s9   ;;  %s2010_s27 = smov %s1618_s29 }
 0x57f   : > { %p15_p7 = scmp.ge.s32.totalorder %s18_s9, 6   ;;  %s2011_s28 = smov %s1622_s30 }
 0x580   : > { %s2012_s29 = smov %s2015_s10  ;;  %s2013_s30 = smov %s2019_s11 }
 0x581   :  { %17 = sbr.rel (!%p15_p7) target bundleno = 3 (0x3), region = 91 }

</bundles_post_ra>
